<compile_context>
chip_gen: v7x
topology: tpu7x:2x2x1
jax: 0.10.0
libtpu: 0.0.40
codegen_flags: <defaults>
</compile_context>

<pallas_src>
import functools
import math

import jax
import jax.numpy as jnp
from jax.experimental import pallas as pl
from jax.experimental.pallas import tpu as pltpu


def _round_up(n, m):
    return -(-n // m) * m


def _fp_kernel(x_ref, w1_ref, b1_ref, w2_ref, b2_ref, o_ref, *, inv_d):
    # ---- LayerNorm over the feature axis (eps = 1e-5), f32 statistics ----
    x = x_ref[...].astype(jnp.float32)
    mean = jnp.sum(x, axis=-1, keepdims=True) * inv_d
    xc = x - mean
    var = jnp.sum(xc * xc, axis=-1, keepdims=True) * inv_d      # two-pass: robust to offsets
    xn = xc * jax.lax.rsqrt(var + 1e-5)
    # gamma/beta are folded into W1/b1 (prepare_params), so xn feeds the matmul directly.

    # ---- input_layer: Linear(d_in -> hidden) + ReLU ----
    h = jnp.dot(xn.astype(w1_ref.dtype), w1_ref[...],
                preferred_element_type=jnp.float32) + b1_ref[...]
    h = jnp.maximum(h, 0.0)

    # dropout -> identity (eval mode).
    # TODO(synk): training-mode dropout (pltpu.prng_random_bits mask + 1/(1-p) scale) not emitted.

    # ---- output_layer: Linear(hidden -> d_out) ----
    y = jnp.dot(h.astype(w2_ref.dtype), w2_ref[...],
                preferred_element_type=jnp.float32) + b2_ref[...]
    o_ref[...] = y.astype(o_ref.dtype)


def function_predictor(x, prep, *, block_b=1024, out_dtype=None):
    """Forward pass.  x: [B, d_in] (f32 or bf16); prep: output of prepare_params()."""
    B, d_in = x.shape
    assert d_in == prep["d_in"], (d_in, prep["d_in"])
    hidden = prep["w1"].shape[1]
    d_out = prep["w2"].shape[1]
    out_dtype = x.dtype if out_dtype is None else out_dtype

    # Keep the row tile no larger than needed for small batches; the sublane dim of a
    # block must stay a multiple of 8 (unless it equals the full array dim).
    block_b = min(block_b, _round_up(B, 8))
    nb = pl.cdiv(B, block_b)     # ragged last block handled by Pallas (masked writes)

    return pl.pallas_call(
        functools.partial(_fp_kernel, inv_d=1.0 / d_in),
        out_shape=jax.ShapeDtypeStruct((B, d_out), out_dtype),
        grid_spec=pltpu.PrefetchScalarGridSpec(
            num_scalar_prefetch=0,
            grid=(nb,),
            in_specs=[
                # Last dims equal the full array widths -> no 128-multiple requirement,
                # no wrapper-side padding, no extra HBM traffic.
                pl.BlockSpec((block_b, d_in), lambda i: (i, 0)),   # x rows (streamed)
                pl.BlockSpec((d_in, hidden), lambda i: (0, 0)),    # W1 (LN affine folded in)
                pl.BlockSpec((1, hidden), lambda i: (0, 0)),       # b1
                pl.BlockSpec((hidden, d_out), lambda i: (0, 0)),   # W2
                pl.BlockSpec((1, d_out), lambda i: (0, 0)),        # b2
            ],
            out_specs=pl.BlockSpec((block_b, d_out), lambda i: (i, 0)),
        ),
        compiler_params=pltpu.CompilerParams(
            # Batch axis is embarrassingly parallel -> megacore sharding on v7x.
            # Tiles are well under every generation's scoped-VMEM default (even v5e's
            # 16 MiB) up to block_b=2048, so no vmem_limit_bytes override is needed.
            dimension_semantics=("parallel",),
        ),
    )(x, prep["w1"], prep["b1"], prep["w2"], prep["b2"])


def init_params(key, input_size, output_size):
    """Parameters matching FunctionPredictor.__init__.

    nn.Linear weights use xavier_uniform_ (stored transposed to [in, out]), biases are
    zero; nn.LayerNorm defaults gamma = 1, beta = 0.
    """
    hidden_size = math.ceil(input_size / 48) * output_size
    k1, k2 = jax.random.split(key)

    def xavier(k, fan_in, fan_out):
        bound = math.sqrt(6.0 / (fan_in + fan_out))
        return jax.random.uniform(k, (fan_in, fan_out), jnp.float32, -bound, bound)

    params = dict(
        gamma=jnp.ones((1, input_size), jnp.float32),
        beta=jnp.zeros((1, input_size), jnp.float32),
        w1=xavier(k1, input_size, hidden_size),
        b1=jnp.zeros((1, hidden_size), jnp.float32),
        w2=xavier(k2, hidden_size, output_size),
        b2=jnp.zeros((1, output_size), jnp.float32),
    )
    return params, hidden_size


def prepare_params(params, matmul_dtype=jnp.bfloat16):
    """One-time parameter transform for the kernel.

    Folds the LayerNorm affine into the first Linear (computed in f32, then cast) and
    stores the matmul weights in `matmul_dtype` (bf16 default: full-rate MXU, halved
    weight DMA; note gamma*W1 is quantized together in that case).  No feature padding:
    Mosaic pads sub-128 dims internally and the kernel is HBM-bound anyway.
    """
    w1_f = params["gamma"].reshape(-1, 1) * params["w1"]              # [d_in, hidden]
    b1_f = params["beta"].reshape(1, -1) @ params["w1"] + params["b1"]
    return dict(
        w1=w1_f.astype(matmul_dtype),
        b1=b1_f.astype(jnp.float32),
        w2=params["w2"].astype(matmul_dtype),
        b2=params["b2"].astype(jnp.float32),
        d_in=params["w1"].shape[0],
    )


def reference(x, p):
    """Pure-JAX f32 reference of the forward pass (eval mode)."""
    mean = jnp.mean(x, axis=-1, keepdims=True)
    var = jnp.mean((x - mean) ** 2, axis=-1, keepdims=True)
    xn = (x - mean) / jnp.sqrt(var + 1e-5) * p["gamma"] + p["beta"]
    h = jnp.maximum(xn @ p["w1"] + p["b1"], 0.0)
    return h @ p["w2"] + p["b2"]


if __name__ == "__main__":
    key = jax.random.PRNGKey(0)
    kx, kp = jax.random.split(key)

    input_size = 96          # hidden_size = ceil(96/48) * 32 = 64
    output_size = 32
    batch = 512
    block_b = 128            # nb = 4: even and >= 4 -> both v7x TCs get 2 pipelined steps

    params, hidden_size = init_params(kp, input_size, output_size)
    x = jax.random.normal(kx, (batch, input_size), dtype=jnp.float32)
    ref = reference(x, params)

    # 1) Bit-accurate path (f32 matmul weights, f32 output) -> tight tolerance.
    prep_f32 = prepare_params(params, matmul_dtype=jnp.float32)
    out_f32 = jax.block_until_ready(function_predictor(x, prep_f32, block_b=block_b))
    assert out_f32.shape == (batch, output_size), out_f32.shape
    assert jnp.allclose(out_f32, ref, atol=1e-4, rtol=1e-4), float(
        jnp.max(jnp.abs(out_f32 - ref)))

    # 2) Performance default: bf16 matmul weights (f32 MXU accumulation) + bf16 output.
    prep_bf16 = prepare_params(params)
    out_bf16 = jax.block_until_ready(
        function_predictor(x, prep_bf16, block_b=block_b, out_dtype=jnp.bfloat16))
    assert out_bf16.dtype == jnp.bfloat16
    assert jnp.allclose(out_bf16.astype(jnp.float32), ref, atol=1e-1, rtol=1e-1), float(
        jnp.max(jnp.abs(out_bf16.astype(jnp.float32) - ref)))

    # 3) Robustness: non-trivial LN affine (exercises the W1/b1 fold) and a batch that
    #    is not a multiple of block_b (ragged last block: no row padding anywhere, the
    #    masked-out rows are simply never written back).
    kg, kb, kx2 = jax.random.split(jax.random.PRNGKey(1), 3)
    params2 = dict(params)
    params2["gamma"] = 1.0 + 0.1 * jax.random.normal(kg, (1, input_size), jnp.float32)
    params2["beta"] = 0.1 * jax.random.normal(kb, (1, input_size), jnp.float32)
    prep2 = prepare_params(params2, matmul_dtype=jnp.float32)
    x2 = jax.random.normal(kx2, (300, input_size), dtype=jnp.float32)
    out2 = jax.block_until_ready(function_predictor(x2, prep2, block_b=block_b))
    ref2 = reference(x2, params2)
    assert out2.shape == (300, output_size), out2.shape
    assert jnp.allclose(out2, ref2, atol=1e-4, rtol=1e-4), float(
        jnp.max(jnp.abs(out2 - ref2)))

    print("KERNEL_OK")
</pallas_src>

<mosaic_0001>
module attributes {stable_mosaic.version = 11 : i64} {
  func.func @_fp_kernel(%arg0: i32, %arg1: memref<128x96xf32, #tpu.memory_space<vmem>>, %arg2: memref<96x64xf32, #tpu.memory_space<vmem>>, %arg3: memref<1x64xf32, #tpu.memory_space<vmem>>, %arg4: memref<64x32xf32, #tpu.memory_space<vmem>>, %arg5: memref<1x32xf32, #tpu.memory_space<vmem>>, %arg6: memref<128x32xf32, #tpu.memory_space<vmem>>) attributes {dimension_semantics = [#tpu.dimension_semantics<parallel>], iteration_bounds = array<i64: 4>, scalar_prefetch = 0 : i64, scratch_operands = 0 : i64, tpu.core_type = #tpu.core_type<tc>, window_params = [{transform_indices = @transform_0, window_bounds = array<i64: 128, 96>}, {pipeline_mode = #tpu.pipeline_mode<synchronous>, transform_indices = @transform_1, window_bounds = array<i64: 96, 64>}, {pipeline_mode = #tpu.pipeline_mode<synchronous>, transform_indices = @transform_2, window_bounds = array<i64: 1, 64>}, {pipeline_mode = #tpu.pipeline_mode<synchronous>, transform_indices = @transform_3, window_bounds = array<i64: 64, 32>}, {pipeline_mode = #tpu.pipeline_mode<synchronous>, transform_indices = @transform_4, window_bounds = array<i64: 1, 32>}, {transform_indices = @transform_5, window_bounds = array<i64: 128, 32>}]} {
    %c0 = arith.constant 0 : index
    %c0_0 = arith.constant 0 : index
    %0 = vector.load %arg1[%c0, %c0_0] : memref<128x96xf32, #tpu.memory_space<vmem>>, vector<128x96xf32>
    %cst = arith.constant dense<0.000000e+00> : vector<128xf32>
    %1 = vector.multi_reduction <add>, %0, %cst [1] : vector<128x96xf32> to vector<128xf32>
    %2 = vector.shape_cast %1 : vector<128xf32> to vector<128x1xf32>
    %cst_1 = arith.constant 0.010416667 : f32
    %3 = vector.broadcast %cst_1 : f32 to vector<128x1xf32>
    %4 = arith.mulf %2, %3 : vector<128x1xf32>
    %5 = vector.broadcast %4 : vector<128x1xf32> to vector<128x96xf32>
    %6 = arith.subf %0, %5 : vector<128x96xf32>
    %7 = arith.mulf %6, %6 : vector<128x96xf32>
    %cst_2 = arith.constant dense<0.000000e+00> : vector<128xf32>
    %8 = vector.multi_reduction <add>, %7, %cst_2 [1] : vector<128x96xf32> to vector<128xf32>
    %9 = vector.shape_cast %8 : vector<128xf32> to vector<128x1xf32>
    %cst_3 = arith.constant 0.010416667 : f32
    %10 = vector.broadcast %cst_3 : f32 to vector<128x1xf32>
    %11 = arith.mulf %9, %10 : vector<128x1xf32>
    %cst_4 = arith.constant 9.99999974E-6 : f32
    %12 = vector.broadcast %cst_4 : f32 to vector<128x1xf32>
    %13 = arith.addf %11, %12 : vector<128x1xf32>
    %14 = math.rsqrt %13 : vector<128x1xf32>
    %15 = vector.broadcast %14 : vector<128x1xf32> to vector<128x96xf32>
    %16 = arith.mulf %6, %15 : vector<128x96xf32>
    %c0_5 = arith.constant 0 : index
    %c0_6 = arith.constant 0 : index
    %17 = vector.load %arg2[%c0_5, %c0_6] : memref<96x64xf32, #tpu.memory_space<vmem>>, vector<96x64xf32>
    %cst_7 = arith.constant dense<0.000000e+00> : vector<128x64xf32>
    %18 = tpu.matmul %16, %17, %cst_7 {dimension_numbers = #tpu.dot_dimension_numbers<[1], [0], [0], [1], [0, 0, 1, 1], [], []>} : vector<128x96xf32>, vector<96x64xf32>, vector<128x64xf32> -> vector<128x64xf32>
    %c0_8 = arith.constant 0 : index
    %c0_9 = arith.constant 0 : index
    %19 = vector.load %arg3[%c0_8, %c0_9] : memref<1x64xf32, #tpu.memory_space<vmem>>, vector<1x64xf32>
    %20 = vector.broadcast %19 : vector<1x64xf32> to vector<128x64xf32>
    %21 = arith.addf %18, %20 : vector<128x64xf32>
    %cst_10 = arith.constant 0.000000e+00 : f32
    %22 = vector.broadcast %cst_10 : f32 to vector<128x64xf32>
    %23 = arith.maximumf %21, %22 : vector<128x64xf32>
    %c0_11 = arith.constant 0 : index
    %c0_12 = arith.constant 0 : index
    %24 = vector.load %arg4[%c0_11, %c0_12] : memref<64x32xf32, #tpu.memory_space<vmem>>, vector<64x32xf32>
    %cst_13 = arith.constant dense<0.000000e+00> : vector<128x32xf32>
    %25 = tpu.matmul %23, %24, %cst_13 {dimension_numbers = #tpu.dot_dimension_numbers<[1], [0], [0], [1], [0, 0, 1, 1], [], []>} : vector<128x64xf32>, vector<64x32xf32>, vector<128x32xf32> -> vector<128x32xf32>
    %c0_14 = arith.constant 0 : index
    %c0_15 = arith.constant 0 : index
    %26 = vector.load %arg5[%c0_14, %c0_15] : memref<1x32xf32, #tpu.memory_space<vmem>>, vector<1x32xf32>
    %27 = vector.broadcast %26 : vector<1x32xf32> to vector<128x32xf32>
    %28 = arith.addf %25, %27 : vector<128x32xf32>
    %c0_16 = arith.constant 0 : index
    %c0_17 = arith.constant 0 : index
    %29 = vector.load %arg6[%c0_16, %c0_17] : memref<128x32xf32, #tpu.memory_space<vmem>>, vector<128x32xf32>
    tpu.vector_store %arg6[%c0_16, %c0_17], %28 {strides = array<i32>} : memref<128x32xf32, #tpu.memory_space<vmem>>, vector<128x32xf32>,
    return
  }
  func.func @transform_0(%arg0: i32) -> (i32, i32) {
    %c0_i32 = arith.constant 0 : i32
    %c0_i32_0 = arith.constant 0 : i32
    return %arg0, %c0_i32 : i32, i32
  }
  func.func @transform_1(%arg0: i32) -> (i32, i32) {
    %c0_i32 = arith.constant 0 : i32
    %c0_i32_0 = arith.constant 0 : i32
    %c0_i32_1 = arith.constant 0 : i32
    return %c0_i32, %c0_i32_0 : i32, i32
  }
  func.func @transform_2(%arg0: i32) -> (i32, i32) {
    %c0_i32 = arith.constant 0 : i32
    %c0_i32_0 = arith.constant 0 : i32
    %c0_i32_1 = arith.constant 0 : i32
    return %c0_i32, %c0_i32_0 : i32, i32
  }
  func.func @transform_3(%arg0: i32) -> (i32, i32) {
    %c0_i32 = arith.constant 0 : i32
    %c0_i32_0 = arith.constant 0 : i32
    %c0_i32_1 = arith.constant 0 : i32
    return %c0_i32, %c0_i32_0 : i32, i32
  }
  func.func @transform_4(%arg0: i32) -> (i32, i32) {
    %c0_i32 = arith.constant 0 : i32
    %c0_i32_0 = arith.constant 0 : i32
    %c0_i32_1 = arith.constant 0 : i32
    return %c0_i32, %c0_i32_0 : i32, i32
  }
  func.func @transform_5(%arg0: i32) -> (i32, i32) {
    %c0_i32 = arith.constant 0 : i32
    %c0_i32_0 = arith.constant 0 : i32
    return %arg0, %c0_i32 : i32, i32
  }
}

</mosaic_0001>

<bundles_post_ra>
// kernel: tpu_custom_call.1
= control target key start
LH: loop header
LB: loop body
LE: loop exit
PB: predicated region body
PF: predicated region fallthrough
CT: control target
= control target key end

     0   :  { %s1266_s18 = smov 0   ;;  %s1604_s0 = inlined_call_operand.vmem [shape: f32[512,96], index: 0, kind: input, shape index: {}]   ;;  %s1605_s1 = inlined_call_operand.vmem [shape: f32[96,64], index: 1, kind: input, shape index: {}]   ;;  %s1606_s2 = inlined_call_operand.vmem [shape: f32[1,64], index: 2, kind: input, shape index: {}]   ;;  %s1607_s3 = inlined_call_operand.vmem [shape: f32[64,32], index: 3, kind: input, shape index: {}]   ;;  %s1608_s4 = inlined_call_operand.vmem [shape: f32[1,32], index: 4, kind: input, shape index: {}]   ;;  %s1609_s5 = inlined_call_operand.vmem [shape: f32[512,32], index: 5, kind: output, shape index: {}]  }
   0x1 LB: > { %s963_s19 = sadd.s32 4294967295, %s1234_s18   ;;  %p967_p0 = scmp.ge.s32.totalorder %s1234_s18, 1  ;;  %s1234_s18 = sphi %s1266_s18, %s15_s18  }
   0x2   : > { %p188_p1 = scmp.lt.s32.totalorder %s1234_s18, 5 }
   0x4   : > { %p189_p2 = pnand %p967_p0, %p188_p1 }
   0x5   : > { %s968_s20 = sshll.u32 (!%p189_p2), %s963_s19, 4  ;;  %vm244_vm0 = vcmask (!%p189_p2), 785408   ;;  %v453_v32 = vld [vmem:[%s1605_s1] sm:$0xff] (!%p189_p2)  ;;  %v454_v33 = vld [vmem:[%s1605_s1 + $0x8] sm:$0xff] (!%p189_p2)  ;;  %vm696_vm1 = vcmask (!%p189_p2), 523264   ;;  %vm890_vm2 = vcmask (!%p189_p2), 261120  }
   0x6   : > { %192 = sbr.rel (%p189_p2) target bundleno = 792 (0x318), region = 40  ;;  %p217_p3 = scmp.lt.s32.totalorder (!%p189_p2), %s968_s20, 63  ;;  %v1148_v34 = vpack.c.bf16 (!%p189_p2), %v454_v33, %v453_v32 }
   0x8   : > { %1149 = vmatprep.subr.bf16.mxu0 (!%p189_p2), %v1148_v34 }
   0x9   : > { %1151 = vmatpush3.bf16.msra.mxu0 (!%p189_p2), %v1148_v34 }
   0xd   : > { %s1611_s20 = smov (!%p217_p3, %s968_s20), 63 }
   0xe   : > { %s969_s21 = sshll.u32 %s1611_s20, 3 }
   0xf   : > { %s1282_s24 = scalar_lea.vmem %s1604_s0, %s969_s21  ;;  %s1567_s27 = scalar_lea.vmem %s1609_s5, %s969_s21 }
  0x10   : > { %v228_v0 = vld [vmem:[%s1282_s24] sm:$0xff]  ;;  %v230_v1 = vld [vmem:[%s1282_s24 + $0x10] sm:$0xff]  ;;  %v1287_v2 = vld [vmem:[%s1282_s24 + $0x8] sm:$0xff] }
  0x11   : > { %v245_v3 = vsel %vm244_vm0, %v228_v0, 0.0  ;;  %v251_v4 = vsel %vm244_vm0, %v230_v1, 0.0  ;;  %v231_v5 = vld [vmem:[%s1282_s24 + $0x18] sm:$0xff]  ;;  %v248_v6 = vsel %vm244_vm0, %v1287_v2, 0.0  ;;  %v1296_v8 = vld [vmem:[%s1282_s24 + $0x20] sm:$0xff]  ;;  %v1299_v9 = vld [vmem:[%s1282_s24 + $0x28] sm:$0xff] }
  0x12   : > { %246 = vadd.xlane.f32.xlu0 %v245_v3  ;;  %252 = vadd.xlane.f32.xlu1 %v251_v4  ;;  %v254_v7 = vsel %vm244_vm0, %v231_v5, 0.0  ;;  %v257_v10 = vsel %vm244_vm0, %v1296_v8, 0.0  ;;  %v260_v11 = vsel %vm244_vm0, %v1299_v9, 0.0  ;;  %v1306_v12 = vld [vmem:[%s1282_s24 + $0x30] sm:$0xff]  ;;  %v1309_v13 = vld [vmem:[%s1282_s24 + $0x38] sm:$0xff]  ;;  %v1316_v16 = vld [vmem:[%s1282_s24 + $0x40] sm:$0xff] }
  0x13   : > { %v263_v14 = vsel %vm244_vm0, %v1306_v12, 0.0  ;;  %v266_v15 = vsel %vm244_vm0, %v1309_v13, 0.0  ;;  %v1319_v17 = vld [vmem:[%s1282_s24 + $0x48] sm:$0xff]  ;;  %v269_v18 = vsel %vm244_vm0, %v1316_v16, 0.0  ;;  %v1326_v20 = vld [vmem:[%s1282_s24 + $0x50] sm:$0xff]  ;;  %v1329_v21 = vld [vmem:[%s1282_s24 + $0x58] sm:$0xff] }
  0x14   : > { %v272_v19 = vsel %vm244_vm0, %v1319_v17, 0.0  ;;  %v275_v22 = vsel %vm244_vm0, %v1326_v20, 0.0  ;;  %v278_v23 = vsel %vm244_vm0, %v1329_v21, 0.0  ;;  %v1336_v24 = vld [vmem:[%s1282_s24 + $0x60] sm:$0xff]  ;;  %v1339_v25 = vld [vmem:[%s1282_s24 + $0x68] sm:$0xff]  ;;  %v1346_v28 = vld [vmem:[%s1282_s24 + $0x70] sm:$0xff] }
  0x15   : > { %v281_v26 = vsel %vm244_vm0, %v1336_v24, 0.0  ;;  %v284_v27 = vsel %vm244_vm0, %v1339_v25, 0.0  ;;  %v1349_v29 = vld [vmem:[%s1282_s24 + $0x78] sm:$0xff]  ;;  %v287_v30 = vsel %vm244_vm0, %v1346_v28, 0.0 }
  0x16   : > { %249 = vadd.xlane.f32.xlu0 %v248_v6  ;;  %255 = vadd.xlane.f32.xlu1 %v254_v7  ;;  %v290_v31 = vsel %vm244_vm0, %v1349_v29, 0.0 }
  0x1a   : > { %258 = vadd.xlane.f32.xlu0 %v257_v10  ;;  %261 = vadd.xlane.f32.xlu1 %v260_v11 }
  0x1e   : > { %264 = vadd.xlane.f32.xlu0 %v263_v14  ;;  %267 = vadd.xlane.f32.xlu1 %v266_v15 }
  0x22   : > { %270 = vadd.xlane.f32.xlu0 %v269_v18  ;;  %273 = vadd.xlane.f32.xlu1 %v272_v19 }
  0x26   : > { %276 = vadd.xlane.f32.xlu0 %v275_v22  ;;  %279 = vadd.xlane.f32.xlu1 %v278_v23  ;;  %v455_v23 = vld [vmem:[%s1605_s1 + $0x10] sm:$0xff] }
  0x2a   : > { %282 = vadd.xlane.f32.xlu0 %v281_v26  ;;  %285 = vadd.xlane.f32.xlu1 %v284_v27 }
  0x2e   : > { %288 = vadd.xlane.f32.xlu0 %v287_v30  ;;  %291 = vadd.xlane.f32.xlu1 %v290_v31 }
  0x9f   : > { %v247_v35 = vpop.xlane.xlu0 %246  ;;  %v253_v36 = vpop.xlane.xlu1 %252 }
  0xa0   : > { %v293_v37 = vmul.f32 0.010416667, %v247_v35  ;;  %v295_v38 = vmul.f32 0.010416667, %v253_v36 }
  0xa2   : > { %v1361_v39 = vsub.f32 %v228_v0, %v293_v37  ;;  %v1363_v40 = vsub.f32 %v230_v1, %v295_v38 }
  0xa3   : > { %v250_v41 = vpop.xlane.xlu0 %249  ;;  %v256_v42 = vpop.xlane.xlu1 %255 }
  0xa4   : > { %v294_v43 = vmul.f32 0.010416667, %v250_v41  ;;  %v296_v44 = vmul.f32 0.010416667, %v256_v42  ;;  %v325_v45 = vmul.f32 %v1361_v39, %v1361_v39  ;;  %v327_v46 = vmul.f32 %v1363_v40, %v1363_v40 }
  0xa6   : > { %v1370_v47 = vsub.f32 %v1287_v2, %v294_v43  ;;  %v1372_v48 = vsub.f32 %v231_v5, %v296_v44  ;;  %v341_v49 = vsel %vm244_vm0, %v325_v45, 0.0  ;;  %v347_v52 = vsel %vm244_vm0, %v327_v46, 0.0  ;;  %v458_v43 = vld [vmem:[%s1605_s1 + $0x28] sm:$0xff] }
  0xa7   : > { %342 = vadd.xlane.f32.xlu0 %v341_v49  ;;  %v259_v50 = vpop.xlane.xlu0 %258  ;;  %v262_v51 = vpop.xlane.xlu1 %261 }
  0xa8   : > { %v297_v53 = vmul.f32 0.010416667, %v259_v50  ;;  %v298_v54 = vmul.f32 0.010416667, %v262_v51  ;;  %v326_v55 = vmul.f32 %v1370_v47, %v1370_v47  ;;  %v328_v56 = vmul.f32 %v1372_v48, %v1372_v48 }
  0xaa   : > { %v1381_v57 = vsub.f32 %v1296_v8, %v297_v53  ;;  %v1384_v58 = vsub.f32 %v1299_v9, %v298_v54  ;;  %v344_v59 = vsel %vm244_vm0, %v326_v55, 0.0  ;;  %v350_v62 = vsel %vm244_vm0, %v328_v56, 0.0  ;;  %v460_v56 = vld [vmem:[%s1605_s1 + $0x38] sm:$0xff] }
  0xab   : > { %348 = vadd.xlane.f32.xlu0 %v347_v52  ;;  %345 = vadd.xlane.f32.xlu1 %v344_v59  ;;  %v265_v60 = vpop.xlane.xlu0 %264  ;;  %v268_v61 = vpop.xlane.xlu1 %267 }
  0xac   : > { %v299_v63 = vmul.f32 0.010416667, %v265_v60  ;;  %v300_v0 = vmul.f32 0.010416667, %v268_v61  ;;  %v329_v1 = vmul.f32 %v1381_v57, %v1381_v57  ;;  %v330_v2 = vmul.f32 %v1384_v58, %v1384_v58 }
  0xae   : > { %v1393_v3 = vsub.f32 %v1306_v12, %v299_v63  ;;  %v1396_v4 = vsub.f32 %v1309_v13, %v300_v0  ;;  %v353_v5 = vsel %vm244_vm0, %v329_v1, 0.0  ;;  %v356_v8 = vsel %vm244_vm0, %v330_v2, 0.0 }
  0xaf   : > { %351 = vadd.xlane.f32.xlu1 %v350_v62  ;;  %354 = vadd.xlane.f32.xlu0 %v353_v5  ;;  %v271_v6 = vpop.xlane.xlu0 %270  ;;  %v274_v7 = vpop.xlane.xlu1 %273 }
  0xb0   : > { %v301_v9 = vmul.f32 0.010416667, %v271_v6  ;;  %v302_v10 = vmul.f32 0.010416667, %v274_v7  ;;  %v331_v11 = vmul.f32 %v1393_v3, %v1393_v3  ;;  %v332_v12 = vmul.f32 %v1396_v4, %v1396_v4  ;;  %v463_v7 = vld [vmem:[%s1605_s1 + $0x50] sm:$0xff] }
  0xb2   : > { %v1405_v14 = vsub.f32 %v1316_v16, %v301_v9  ;;  %v1408_v13 = vsub.f32 %v1319_v17, %v302_v10  ;;  %v359_v15 = vsel %vm244_vm0, %v331_v11, 0.0  ;;  %v362_v22 = vsel %vm244_vm0, %v332_v12, 0.0  ;;  %v456_v16 = vld [vmem:[%s1605_s1 + $0x18] sm:$0xff]  ;;  %v681_v10 = vld [vmem:[%s1607_s3] sm:$0xff]  ;;  %v682_v11 = vld [vmem:[%s1607_s3 + $0x8] sm:$0xff] }
  0xb3   : > { %357 = vadd.xlane.f32.xlu1 %v356_v8  ;;  %360 = vadd.xlane.f32.xlu0 %v359_v15  ;;  %v277_v18 = vpop.xlane.xlu0 %276  ;;  %v280_v19 = vpop.xlane.xlu1 %279  ;;  %v1152_v31 = vpack.c.bf16 %v456_v16, %v455_v23  ;;  %v464_v8 = vld [vmem:[%s1605_s1 + $0x58] sm:$0xff]  ;;  %v683_v12 = vld [vmem:[%s1607_s3 + $0x10] sm:$0xff]  ;;  %v1172_v15 = vpack.c.bf16 %v682_v11, %v681_v10  ;;  %v686_v23 = vld [vmem:[%s1607_s3 + $0x28] sm:$0xff] }
  0xb4   : > { %v303_v26 = vmul.f32 0.010416667, %v277_v18  ;;  %v304_v27 = vmul.f32 0.010416667, %v280_v19  ;;  %v333_v17 = vmul.f32 %v1405_v14, %v1405_v14  ;;  %v334_v30 = vmul.f32 %v1408_v13, %v1408_v13  ;;  %v684_v18 = vld [vmem:[%s1607_s3 + $0x18] sm:$0xff] }
  0xb5   : > { %1153 = vmatprep.subr.bf16.mxu0 %v1152_v31  ;;  %v1168_v9 = vpack.c.bf16 %v464_v8, %v463_v7  ;;  %v1176_v19 = vpack.c.bf16 %v684_v18, %v683_v12  ;;  %1173 = vmatprep.subr.bf16.mxu1 %v1172_v15 }
  0xb6   : > { %v1423_v32 = vsub.f32 %v1326_v20, %v303_v26  ;;  %v1426_v33 = vsub.f32 %v1329_v21, %v304_v27  ;;  %v365_v34 = vsel %vm244_vm0, %v333_v17, 0.0  ;;  %v368_v37 = vsel %vm244_vm0, %v334_v30, 0.0  ;;  %v457_v21 = vld [vmem:[%s1605_s1 + $0x20] sm:$0xff]  ;;  %1155 = vmatpush3.bf16.msra.mxu0 %v1152_v31  ;;  %1175 = vmatpush3.bf16.msra.mxu1 %v1172_v15 }
  0xb7   : > { %363 = vadd.xlane.f32.xlu1 %v362_v22  ;;  %366 = vadd.xlane.f32.xlu0 %v365_v34  ;;  %v283_v35 = vpop.xlane.xlu0 %282  ;;  %v286_v36 = vpop.xlane.xlu1 %285  ;;  %v1156_v44 = vpack.c.bf16 %v458_v43, %v457_v21  ;;  %v685_v22 = vld [vmem:[%s1607_s3 + $0x20] sm:$0xff] }
  0xb8   : > { %v305_v38 = vmul.f32 0.010416667, %v283_v35  ;;  %v306_v41 = vmul.f32 0.010416667, %v286_v36  ;;  %v335_v42 = vmul.f32 %v1423_v32, %v1423_v32  ;;  %v336_v20 = vmul.f32 %v1426_v33, %v1426_v33  ;;  %1177 = vmatprep.subr.bf16.mxu1 %v1176_v19 }
  0xb9   : > { %1157 = vmatprep.subr.bf16.mxu0 %v1156_v44  ;;  %v1180_v16 = vpack.c.bf16 %v686_v23, %v685_v22 }
  0xba   : > { %v1441_v45 = vsub.f32 %v1336_v24, %v305_v38  ;;  %v1444_v46 = vsub.f32 %v1339_v25, %v306_v41  ;;  %v371_v49 = vsel %vm244_vm0, %v335_v42, 0.0  ;;  %v374_v52 = vsel %vm244_vm0, %v336_v20, 0.0  ;;  %v459_v25 = vld [vmem:[%s1605_s1 + $0x30] sm:$0xff]  ;;  %1159 = vmatpush3.bf16.msra.mxu0 %v1156_v44  ;;  %1179 = vmatpush3.bf16.msra.mxu1 %v1176_v19 }
  0xbb   : > { %369 = vadd.xlane.f32.xlu1 %v368_v37  ;;  %372 = vadd.xlane.f32.xlu0 %v371_v49  ;;  %v289_v50 = vpop.xlane.xlu0 %288  ;;  %v292_v51 = vpop.xlane.xlu1 %291  ;;  %v1160_v59 = vpack.c.bf16 %v460_v56, %v459_v25 }
  0xbc   : > { %v307_v53 = vmul.f32 0.010416667, %v289_v50  ;;  %v308_v54 = vmul.f32 0.010416667, %v292_v51  ;;  %v337_v55 = vmul.f32 %v1441_v45, %v1441_v45  ;;  %v338_v24 = vmul.f32 %v1444_v46, %v1444_v46  ;;  %1181 = vmatprep.subr.bf16.mxu1 %v1180_v16 }
  0xbd   : > { %1161 = vmatprep.subr.bf16.mxu0 %v1160_v59 }
  0xbe   : > { %v1459_v60 = vsub.f32 %v1346_v28, %v307_v53  ;;  %v1462_v61 = vsub.f32 %v1349_v29, %v308_v54  ;;  %v377_v62 = vsel %vm244_vm0, %v337_v55, 0.0  ;;  %v380_v63 = vsel %vm244_vm0, %v338_v24, 0.0  ;;  %v461_v28 = vld [vmem:[%s1605_s1 + $0x40] sm:$0xff]  ;;  %v462_v29 = vld [vmem:[%s1605_s1 + $0x48] sm:$0xff]  ;;  %1163 = vmatpush3.bf16.msra.mxu0 %v1160_v59  ;;  %1183 = vmatpush3.bf16.msra.mxu1 %v1180_v16 }
  0xbf   : > { %375 = vadd.xlane.f32.xlu1 %v374_v52  ;;  %378 = vadd.xlane.f32.xlu0 %v377_v62  ;;  %v1164_v2 = vpack.c.bf16 %v462_v29, %v461_v28 }
  0xc0   : > { %v339_v0 = vmul.f32 %v1459_v60, %v1459_v60  ;;  %v340_v1 = vmul.f32 %v1462_v61, %v1462_v61 }
  0xc1   : > { %1165 = vmatprep.subr.bf16.mxu0 %v1164_v2 }
  0xc2   : > { %v383_v5 = vsel %vm244_vm0, %v339_v0, 0.0  ;;  %v386_v6 = vsel %vm244_vm0, %v340_v1, 0.0  ;;  %1167 = vmatpush3.bf16.msra.mxu0 %v1164_v2 }
  0xc3   : > { %381 = vadd.xlane.f32.xlu1 %v380_v63  ;;  %384 = vadd.xlane.f32.xlu0 %v383_v5 }
  0xc4   : > { %1169 = vmatprep.subr.bf16.mxu0 %v1168_v9 }
  0xc6   : > { %1171 = vmatpush3.bf16.msra.mxu0 %v1168_v9 }
  0xc7   : > { %387 = vadd.xlane.f32.xlu1 %v386_v6 }
 0x134   : > { %v343_v26 = vpop.xlane.xlu0 %342 }
 0x135   : > { %v389_v27 = vmul.f32 0.010416667, %v343_v26 }
 0x137   : > { %v405_v17 = vadd.f32 1e-05, %v389_v27 }
 0x138   : > { %v346_v30 = vpop.xlane.xlu1 %345  ;;  %v349_v31 = vpop.xlane.xlu0 %348 }
 0x139   : > { %1196 = vrsqrt.f32 %v405_v17  ;;  %v390_v34 = vmul.f32 0.010416667, %v346_v30  ;;  %v391_v35 = vmul.f32 0.010416667, %v349_v31 }
 0x13b   : > { %v406_v36 = vadd.f32 1e-05, %v390_v34  ;;  %v407_v37 = vadd.f32 1e-05, %v391_v35 }
 0x13c   : > { %v352_v38 = vpop.xlane.xlu1 %351  ;;  %v355_v41 = vpop.xlane.xlu0 %354 }
 0x13d   : > { %1198 = vrsqrt.f32 %v406_v36  ;;  %v392_v42 = vmul.f32 0.010416667, %v352_v38  ;;  %v393_v20 = vmul.f32 0.010416667, %v355_v41 }
 0x13e   : > { %1200 = vrsqrt.f32 %v407_v37 }
 0x13f   : > { %v408_v21 = vadd.f32 1e-05, %v392_v42  ;;  %v409_v43 = vadd.f32 1e-05, %v393_v20 }
 0x140   : > { %v358_v44 = vpop.xlane.xlu1 %357  ;;  %v361_v49 = vpop.xlane.xlu0 %360 }
 0x141   : > { %1202 = vrsqrt.f32 %v408_v21  ;;  %v394_v50 = vmul.f32 0.010416667, %v358_v44  ;;  %v395_v51 = vmul.f32 0.010416667, %v361_v49 }
 0x142   : > { %1204 = vrsqrt.f32 %v409_v43 }
 0x143   : > { %v1197_v52 = vpop.eup %1196  ;;  %v410_v53 = vadd.f32 1e-05, %v394_v50  ;;  %v411_v54 = vadd.f32 1e-05, %v395_v51 }
 0x144   : > { %v364_v55 = vpop.xlane.xlu1 %363  ;;  %v367_v24 = vpop.xlane.xlu0 %366  ;;  %v437_v25 = vmul.f32 %v1197_v52, %v1361_v39 }
 0x145   : > { %1206 = vrsqrt.f32 %v410_v53  ;;  %v396_v56 = vmul.f32 0.010416667, %v364_v55  ;;  %v397_v59 = vmul.f32 0.010416667, %v367_v24 }
 0x146   : > { %1208 = vrsqrt.f32 %v411_v54  ;;  %1084 = vmatprep.mubr.msk.f32.mxu0 %vm244_vm0, %v437_v25 }
 0x147   : > { %v1199_v62 = vpop.eup %1198  ;;  %v412_v63 = vadd.f32 1e-05, %v396_v56  ;;  %v413_v0 = vadd.f32 1e-05, %v397_v59 }
 0x148   : > { %v1201_v1 = vpop.eup %1200  ;;  %v370_v28 = vpop.xlane.xlu1 %369  ;;  %v438_v2 = vmul.f32 %v1199_v62, %v1370_v47 }
 0x149   : > { %v373_v29 = vpop.xlane.xlu0 %372  ;;  %1210 = vrsqrt.f32 %v412_v63  ;;  %v398_v5 = vmul.f32 0.010416667, %v370_v28  ;;  %v439_v7 = vmul.f32 %v1201_v1, %v1363_v40 }
 0x14a   : > { %v399_v6 = vmul.f32 0.010416667, %v373_v29  ;;  %1212 = vrsqrt.f32 %v413_v0  ;;  %1085 = vmatmul.mubr.msk.f32.vlgmr.msra.gmra.mrb[0].mxu0 %vm244_vm0, %v438_v2 }
 0x14b   : > { %v1203_v39 = vpop.eup %1202  ;;  %v414_v8 = vadd.f32 1e-05, %v398_v5  ;;  %1087 = vmatprep.mubr.msk.f32.mxu0 %vm244_vm0, %v439_v7 }
 0x14c   : > { %v415_v9 = vadd.f32 1e-05, %v399_v6  ;;  %v1205_v10 = vpop.eup %1204  ;;  %v376_v11 = vpop.xlane.xlu1 %375  ;;  %v440_v15 = vmul.f32 %v1203_v39, %v1372_v48 }
 0x14d   : > { %v379_v12 = vpop.xlane.xlu0 %378  ;;  %1214 = vrsqrt.f32 %v414_v8  ;;  %v400_v47 = vmul.f32 0.010416667, %v376_v11  ;;  %v441_v19 = vmul.f32 %v1205_v10, %v1381_v57 }
 0x14e   : > { %v401_v18 = vmul.f32 0.010416667, %v379_v12  ;;  %1216 = vrsqrt.f32 %v415_v9  ;;  %1088 = vmatmul.mubr.msk.f32.gmra.mrb[2].mxu0 %vm244_vm0, %v440_v15 }
 0x14f   : > { %v1207_v40 = vpop.eup %1206  ;;  %v416_v22 = vadd.f32 1e-05, %v400_v47  ;;  %1090 = vmatprep.mubr.msk.f32.mxu0 %vm244_vm0, %v441_v19 }
 0x150   : > { %v417_v23 = vadd.f32 1e-05, %v401_v18  ;;  %v1209_v16 = vpop.eup %1208  ;;  %v382_v26 = vpop.xlane.xlu1 %381  ;;  %v442_v17 = vmul.f32 %v1207_v40, %v1384_v58 }
 0x151   : > { %v385_v27 = vpop.xlane.xlu0 %384  ;;  %1218 = vrsqrt.f32 %v416_v22  ;;  %v402_v48 = vmul.f32 0.010416667, %v382_v26  ;;  %v443_v31 = vmul.f32 %v1209_v16, %v1393_v3 }
 0x152   : > { %v403_v30 = vmul.f32 0.010416667, %v385_v27  ;;  %1220 = vrsqrt.f32 %v417_v23  ;;  %1091 = vmatmul.mubr.msk.f32.gmra.mrb[4].mxu0 %vm244_vm0, %v442_v17 }
 0x153   : > { %v1211_v57 = vpop.eup %1210  ;;  %v418_v34 = vadd.f32 1e-05, %v402_v48  ;;  %1093 = vmatprep.mubr.msk.f32.mxu0 %vm244_vm0, %v443_v31 }
 0x154   : > { %v419_v35 = vadd.f32 1e-05, %v403_v30  ;;  %v1213_v36 = vpop.eup %1212  ;;  %v388_v37 = vpop.xlane.xlu1 %387  ;;  %v444_v38 = vmul.f32 %v1211_v57, %v1396_v4 }
 0x155   : > { %1222 = vrsqrt.f32 %v418_v34  ;;  %v404_v41 = vmul.f32 0.010416667, %v388_v37  ;;  %v445_v58 = vmul.f32 %v1213_v36, %v1405_v14 }
 0x156   : > { %1224 = vrsqrt.f32 %v419_v35  ;;  %1094 = vmatmul.mubr.msk.f32.gmra.mrb[6].mxu0 %vm244_vm0, %v444_v38 }
 0x157   : > { %v1215_v3 = vpop.eup %1214  ;;  %v420_v42 = vadd.f32 1e-05, %v404_v41  ;;  %1096 = vmatprep.mubr.msk.f32.mxu0 %vm244_vm0, %v445_v58 }
 0x158   : > { %v1217_v20 = vpop.eup %1216  ;;  %v446_v21 = vmul.f32 %v1215_v3, %v1408_v13 }
 0x159   : > { %1226 = vrsqrt.f32 %v420_v42  ;;  %v447_v43 = vmul.f32 %v1217_v20, %v1423_v32 }
 0x15a   : > { %1097 = vmatmul.mubr.msk.f32.gmra.mrb[8].mxu0 %vm244_vm0, %v446_v21  ;;  %v989_v21 = vld [vmem:[%s1608_s4] ss:$0 sm:$0xff] }
 0x15b   : > { %v1219_v4 = vpop.eup %1218  ;;  %1099 = vmatprep.mubr.msk.f32.mxu0 %vm244_vm0, %v447_v43 }
 0x15c   : > { %v1221_v44 = vpop.eup %1220  ;;  %v448_v14 = vmul.f32 %v1219_v4, %v1426_v33  ;;  %v687_v33 = vld [vmem:[%s1607_s3 + $0x30] sm:$0xff] }
 0x15d   : > { %v449_v49 = vmul.f32 %v1221_v44, %v1441_v45  ;;  %v688_v45 = vld [vmem:[%s1607_s3 + $0x38] sm:$0xff] }
 0x15e   : > { %1100 = vmatmul.mubr.msk.f32.gmra.mrb[10].mxu0 %vm244_vm0, %v448_v14 }
 0x15f   : > { %v1223_v50 = vpop.eup %1222  ;;  %1102 = vmatprep.mubr.msk.f32.mxu0 %vm244_vm0, %v449_v49 }
 0x160   : > { %v1225_v51 = vpop.eup %1224  ;;  %v450_v13 = vmul.f32 %v1223_v50, %v1444_v46  ;;  %v1184_v46 = vpack.c.bf16 %v688_v45, %v687_v33 }
 0x161   : > { %v451_v32 = vmul.f32 %v1225_v51, %v1459_v60  ;;  %v972_v60 = vld [vmem:[%s1606_s2] ss:$0 sm:$0xff] }
 0x162   : > { %1103 = vmatmul.mubr.msk.f32.gmra.mrb[12].mxu0 %vm244_vm0, %v450_v13  ;;  %1185 = vmatprep.subr.bf16.mxu1 %v1184_v46 }
 0x163   : > { %v1227_v52 = vpop.eup %1226  ;;  %1105 = vmatprep.mubr.msk.f32.mxu0 %vm244_vm0, %v451_v32  ;;  %1187 = vmatpush3.bf16.msra.mxu1 %v1184_v46 }
 0x164   : > { %v452_v53 = vmul.f32 %v1227_v52, %v1462_v61 }
 0x166   : > { %1106 = vmatmul.mubr.msk.f32.gmra.mrb[14].mxu0 %vm244_vm0, %v452_v53 }
 0x21d   : > { %v1086_v54 = vpop.f32.mrb[0].mxu0 }
 0x21e   : > { %v592_v55 = vadd.f32 %v1086_v54, %v972_v60  ;;  %v586_v61 = vpop.f32.mrb[1].mxu0 }
 0x21f   : > { %v587_v24 = vadd.f32 %v972_v60, %v586_v61 }
 0x220   : > { %v666_v59 = vmax.f32 %v592_v55, 0.0 }
 0x221   : > { %v665_v25 = vmax.f32 %v587_v24, 0.0  ;;  %v1089_v56 = vpop.f32.mrb[2].mxu0 }
 0x222   : > { %v602_v62 = vadd.f32 %v1089_v56, %v972_v60  ;;  %v596_v63 = vpop.f32.mrb[3].mxu0 }
 0x223   : > { %v597_v0 = vadd.f32 %v972_v60, %v596_v63  ;;  %1124 = vmatprep.mubr.msk.f32.mxu1 %vm696_vm1, %v665_v25 }
 0x224   : > { %1125 = vmatmul.mubr.msk.f32.vlgmr.msra.gmra.mrb[0].mxu1 %vm696_vm1, %v666_v59  ;;  %v668_v29 = vmax.f32 %v602_v62, 0.0 }
 0x225   : > { %v667_v1 = vmax.f32 %v597_v0, 0.0  ;;  %v1092_v28 = vpop.f32.mrb[4].mxu0 }
 0x226   : > { %v612_v2 = vadd.f32 %v1092_v28, %v972_v60  ;;  %v606_v5 = vpop.f32.mrb[5].mxu0 }
 0x227   : > { %v607_v6 = vadd.f32 %v972_v60, %v606_v5  ;;  %1127 = vmatprep.mubr.msk.f32.mxu1 %vm696_vm1, %v667_v1 }
 0x228   : > { %1128 = vmatmul.mubr.msk.f32.gmra.mrb[2].mxu1 %vm696_vm1, %v668_v29  ;;  %v670_v8 = vmax.f32 %v612_v2, 0.0 }
 0x229   : > { %v669_v7 = vmax.f32 %v607_v6, 0.0  ;;  %v1095_v39 = vpop.f32.mrb[6].mxu0 }
 0x22a   : > { %v622_v9 = vadd.f32 %v1095_v39, %v972_v60  ;;  %v616_v10 = vpop.f32.mrb[7].mxu0 }
 0x22b   : > { %v617_v11 = vadd.f32 %v972_v60, %v616_v10  ;;  %1130 = vmatprep.mubr.msk.f32.mxu1 %vm696_vm1, %v669_v7 }
 0x22c   : > { %1131 = vmatmul.mubr.msk.f32.gmra.mrb[4].mxu1 %vm696_vm1, %v670_v8  ;;  %v672_v47 = vmax.f32 %v622_v9, 0.0 }
 0x22d   : > { %v671_v12 = vmax.f32 %v617_v11, 0.0  ;;  %v1098_v15 = vpop.f32.mrb[8].mxu0 }
 0x22e   : > { %v632_v18 = vadd.f32 %v1098_v15, %v972_v60  ;;  %v626_v19 = vpop.f32.mrb[9].mxu0 }
 0x22f   : > { %v627_v40 = vadd.f32 %v972_v60, %v626_v19  ;;  %1133 = vmatprep.mubr.msk.f32.mxu1 %vm696_vm1, %v671_v12 }
 0x230   : > { %1134 = vmatmul.mubr.msk.f32.gmra.mrb[6].mxu1 %vm696_vm1, %v672_v47  ;;  %v674_v16 = vmax.f32 %v632_v18, 0.0 }
 0x231   : > { %v673_v22 = vmax.f32 %v627_v40, 0.0  ;;  %v1101_v23 = vpop.f32.mrb[10].mxu0 }
 0x232   : > { %v642_v26 = vadd.f32 %v1101_v23, %v972_v60  ;;  %v636_v27 = vpop.f32.mrb[11].mxu0 }
 0x233   : > { %v637_v17 = vadd.f32 %v972_v60, %v636_v27  ;;  %1136 = vmatprep.mubr.msk.f32.mxu1 %vm696_vm1, %v673_v22 }
 0x234   : > { %1137 = vmatmul.mubr.msk.f32.gmra.mrb[8].mxu1 %vm696_vm1, %v674_v16  ;;  %v676_v31 = vmax.f32 %v642_v26, 0.0 }
 0x235   : > { %v675_v48 = vmax.f32 %v637_v17, 0.0  ;;  %v1104_v30 = vpop.f32.mrb[12].mxu0 }
 0x236   : > { %v652_v57 = vadd.f32 %v1104_v30, %v972_v60  ;;  %v646_v34 = vpop.f32.mrb[13].mxu0 }
 0x237   : > { %v647_v35 = vadd.f32 %v972_v60, %v646_v34  ;;  %1139 = vmatprep.mubr.msk.f32.mxu1 %vm696_vm1, %v675_v48 }
 0x238   : > { %1140 = vmatmul.mubr.msk.f32.gmra.mrb[10].mxu1 %vm696_vm1, %v676_v31  ;;  %v678_v38 = vmax.f32 %v652_v57, 0.0 }
 0x239   : > { %v677_v36 = vmax.f32 %v647_v35, 0.0  ;;  %v1107_v37 = vpop.f32.mrb[14].mxu0 }
 0x23a   : > { %v662_v41 = vadd.f32 %v1107_v37, %v972_v60  ;;  %v656_v58 = vpop.f32.mrb[15].mxu0 }
 0x23b   : > { %v657_v3 = vadd.f32 %v972_v60, %v656_v58  ;;  %1142 = vmatprep.mubr.msk.f32.mxu1 %vm696_vm1, %v677_v36 }
 0x23c   : > { %1143 = vmatmul.mubr.msk.f32.gmra.mrb[12].mxu1 %vm696_vm1, %v678_v38  ;;  %v680_v20 = vmax.f32 %v662_v41, 0.0 }
 0x23d   : > { %v679_v42 = vmax.f32 %v657_v3, 0.0 }
 0x23f   : > { %1145 = vmatprep.mubr.msk.f32.mxu1 %vm696_vm1, %v679_v42 }
 0x240   : > { %1146 = vmatmul.mubr.msk.f32.gmra.mrb[14].mxu1 %vm696_vm1, %v680_v20 }
 0x2f7   : > { %v1126_v43 = vpop.f32.mrb[0].mxu1 }
 0x2f8   : > { %v817_v4 = vadd.f32 %v1126_v43, %v989_v21  ;;  %v811_v44 = vpop.f32.mrb[1].mxu1 }
 0x2f9   : > { %v812_v14 = vadd.f32 %v989_v21, %v811_v44 }
 0x2fa   : > { %892 = vst.msk [vmem:[%s1567_s27 + $0x8] sm:$0xff] %vm890_vm2, %v817_v4 }
 0x2fb   : > { %891 = vst.msk [vmem:[%s1567_s27] sm:$0xff] %vm890_vm2, %v812_v14  ;;  %v1129_v49 = vpop.f32.mrb[2].mxu1 }
 0x2fc   : > { %v827_v50 = vadd.f32 %v1129_v49, %v989_v21  ;;  %v821_v51 = vpop.f32.mrb[3].mxu1 }
 0x2fd   : > { %v822_v13 = vadd.f32 %v989_v21, %v821_v51 }
 0x2fe   : > { %894 = vst.msk [vmem:[%s1567_s27 + $0x18] sm:$0xff] %vm890_vm2, %v827_v50 }
 0x2ff   : > { %893 = vst.msk [vmem:[%s1567_s27 + $0x10] sm:$0xff] %vm890_vm2, %v822_v13  ;;  %v1132_v32 = vpop.f32.mrb[4].mxu1 }
 0x300   : > { %v837_v52 = vadd.f32 %v1132_v32, %v989_v21  ;;  %v831_v53 = vpop.f32.mrb[5].mxu1 }
 0x301   : > { %v832_v33 = vadd.f32 %v989_v21, %v831_v53 }
 0x302   : > { %896 = vst.msk [vmem:[%s1567_s27 + $0x28] sm:$0xff] %vm890_vm2, %v837_v52 }
 0x303   : > { %895 = vst.msk [vmem:[%s1567_s27 + $0x20] sm:$0xff] %vm890_vm2, %v832_v33  ;;  %v1135_v45 = vpop.f32.mrb[6].mxu1 }
 0x304   : > { %v847_v46 = vadd.f32 %v1135_v45, %v989_v21  ;;  %v841_v60 = vpop.f32.mrb[7].mxu1 }
 0x305   : > { %v842_v54 = vadd.f32 %v989_v21, %v841_v60 }
 0x306   : > { %898 = vst.msk [vmem:[%s1567_s27 + $0x38] sm:$0xff] %vm890_vm2, %v847_v46 }
 0x307   : > { %897 = vst.msk [vmem:[%s1567_s27 + $0x30] sm:$0xff] %vm890_vm2, %v842_v54  ;;  %v1138_v55 = vpop.f32.mrb[8].mxu1 }
 0x308   : > { %v857_v61 = vadd.f32 %v1138_v55, %v989_v21  ;;  %v851_v24 = vpop.f32.mrb[9].mxu1 }
 0x309   : > { %v852_v25 = vadd.f32 %v989_v21, %v851_v24 }
 0x30a   : > { %900 = vst.msk [vmem:[%s1567_s27 + $0x48] sm:$0xff] %vm890_vm2, %v857_v61 }
 0x30b   : > { %899 = vst.msk [vmem:[%s1567_s27 + $0x40] sm:$0xff] %vm890_vm2, %v852_v25  ;;  %v1141_v56 = vpop.f32.mrb[10].mxu1 }
 0x30c   : > { %v867_v59 = vadd.f32 %v1141_v56, %v989_v21  ;;  %v861_v62 = vpop.f32.mrb[11].mxu1 }
 0x30d   : > { %v862_v63 = vadd.f32 %v989_v21, %v861_v62 }
 0x30e   : > { %902 = vst.msk [vmem:[%s1567_s27 + $0x58] sm:$0xff] %vm890_vm2, %v867_v59 }
 0x30f   : > { %901 = vst.msk [vmem:[%s1567_s27 + $0x50] sm:$0xff] %vm890_vm2, %v862_v63  ;;  %v1144_v0 = vpop.f32.mrb[12].mxu1 }
 0x310   : > { %v877_v1 = vadd.f32 %v1144_v0, %v989_v21  ;;  %v871_v28 = vpop.f32.mrb[13].mxu1 }
 0x311   : > { %v872_v29 = vadd.f32 %v989_v21, %v871_v28 }
 0x312   : > { %904 = vst.msk [vmem:[%s1567_s27 + $0x68] sm:$0xff] %vm890_vm2, %v877_v1 }
 0x313   : > { %903 = vst.msk [vmem:[%s1567_s27 + $0x60] sm:$0xff] %vm890_vm2, %v872_v29  ;;  %v1147_v2 = vpop.f32.mrb[14].mxu1 }
 0x314   : > { %v887_v5 = vadd.f32 %v1147_v2, %v989_v21  ;;  %v881_v6 = vpop.f32.mrb[15].mxu1 }
 0x315   : > { %v882_v7 = vadd.f32 %v989_v21, %v881_v6 }
 0x316   : > { %906 = vst.msk [vmem:[%s1567_s27 + $0x78] sm:$0xff] %vm890_vm2, %v887_v5 }
 0x317   : > { %905 = vst.msk [vmem:[%s1567_s27 + $0x70] sm:$0xff] %vm890_vm2, %v882_v7 }
 0x318 PF: > { %s15_s18 = sadd.s32 1, %s1234_s18  }
 0x319   : > { %p12_p4 = scmp.ge.s32.totalorder %s15_s18, 6  }
 0x31b   :  { %14 = sbr.rel (!%p12_p4) target bundleno = 1 (0x1), region = 70 }

</bundles_post_ra>
